<compile_context>
chip_gen: v5e
topology: v5e:2x2
jax: 0.10.0
libtpu: 0.0.40
codegen_flags: <defaults>
</compile_context>

<pallas_src>
import functools

import numpy as np
import jax
import jax.numpy as jnp
from jax.experimental import pallas as pl
from jax.experimental.pallas import tpu as pltpu

NEG_BIG = -9.0e15        # matches the module's -9000000000000000.0 mask value
PAD_NEG = -1.0e30        # extra bias that removes padded columns from the softmax
LANE = 128
TM = 128                 # row tile (query nodes)
TN = 256                 # column tile (key nodes, softmax reduction axis)
TK = 256                 # input-channel reduction tile


def _round_up(x, m):
    return (x + m - 1) // m * m


def _leaky_relu(x, alpha):
    return jnp.where(x >= 0, x, alpha * x)


# --------------------- kernel 1: Wh = h @ W (+ packed a-proj) --------------------- #
def _wh_kernel_single(h_ref, w_ref, ap_ref, wh_ref, f_ref):
    # K fits in one tile: no scratch accumulator, no init/epilogue branches.
    wh = jnp.dot(h_ref[...], w_ref[...], preferred_element_type=jnp.float32)
    wh_ref[...] = wh.astype(wh_ref.dtype)
    f_ref[...] = jnp.dot(wh, ap_ref[...], preferred_element_type=jnp.float32)


def _wh_kernel_multi(h_ref, w_ref, ap_ref, wh_ref, f_ref, acc_ref):
    k = pl.program_id(1)

    @pl.when(k == 0)
    def _():
        acc_ref[...] = jnp.zeros_like(acc_ref)

    acc_ref[...] += jnp.dot(h_ref[...], w_ref[...],
                            preferred_element_type=jnp.float32)

    @pl.when(k == pl.num_programs(1) - 1)
    def _():
        wh = acc_ref[...]
        wh_ref[...] = wh.astype(wh_ref.dtype)
        f_ref[...] = jnp.dot(wh, ap_ref[...], preferred_element_type=jnp.float32)


def _wh_projection(h_pad, w_pad, a_pack, *, tm, tk):
    n_pad, cin_pad = h_pad.shape
    cout_pad = w_pad.shape[1]
    nk = cin_pad // tk
    out_shape = (jax.ShapeDtypeStruct((n_pad, cout_pad), jnp.float32),
                 jax.ShapeDtypeStruct((n_pad, LANE), jnp.float32))
    cost = pl.CostEstimate(
        flops=2 * n_pad * cin_pad * cout_pad + 2 * n_pad * cout_pad * LANE,
        transcendentals=0,
        bytes_accessed=4 * (h_pad.size + w_pad.size + a_pack.size
                            + n_pad * cout_pad + n_pad * LANE),
    )
    if nk == 1:
        grid_spec = pltpu.PrefetchScalarGridSpec(
            num_scalar_prefetch=0,
            grid=(n_pad // tm,),
            in_specs=[
                pl.BlockSpec((tm, cin_pad), lambda i: (i, 0)),
                pl.BlockSpec((cin_pad, cout_pad), lambda i: (0, 0)),  # resident W
                pl.BlockSpec((cout_pad, LANE), lambda i: (0, 0)),     # resident a_pack
            ],
            out_specs=[
                pl.BlockSpec((tm, cout_pad), lambda i: (i, 0)),
                pl.BlockSpec((tm, LANE), lambda i: (i, 0)),
            ],
        )
        kernel = _wh_kernel_single
        dims = ("parallel",)
    else:
        grid_spec = pltpu.PrefetchScalarGridSpec(
            num_scalar_prefetch=0,
            grid=(n_pad // tm, nk),
            in_specs=[
                pl.BlockSpec((tm, tk), lambda i, k: (i, k)),
                pl.BlockSpec((tk, cout_pad), lambda i, k: (k, 0)),
                pl.BlockSpec((cout_pad, LANE), lambda i, k: (0, 0)),
            ],
            out_specs=[
                pl.BlockSpec((tm, cout_pad), lambda i, k: (i, 0)),
                pl.BlockSpec((tm, LANE), lambda i, k: (i, 0)),
            ],
            scratch_shapes=[pltpu.VMEM((tm, cout_pad), jnp.float32)],
        )
        kernel = _wh_kernel_multi
        dims = ("parallel", "arbitrary")
    return pl.pallas_call(
        kernel,
        out_shape=out_shape,
        grid_spec=grid_spec,
        compiler_params=pltpu.CompilerParams(dimension_semantics=dims),
        cost_estimate=cost,
    )(h_pad, w_pad, a_pack)


# -------------------- kernel 2: masked online-softmax attention -------------------- #
def _attention_kernel(n_ref, f1_ref, f2t_ref, adj_ref, wh_ref, out_ref,
                      m_ref, l_ref, acc_ref, *, alpha, concat, tn):
    j = pl.program_id(1)

    @pl.when(j == 0)
    def _():
        m_ref[...] = jnp.full_like(m_ref, -jnp.inf)
        l_ref[...] = jnp.zeros_like(l_ref)
        acc_ref[...] = jnp.zeros_like(acc_ref)

    # column-padding mask generated in-kernel (no extra HBM stream)
    n_real = n_ref[0]
    col_ids = j * tn + jax.lax.broadcasted_iota(jnp.int32, (1, tn), 1)
    colmask = jnp.where(col_ids < n_real, jnp.float32(0.0), jnp.float32(PAD_NEG))

    # attention logits for this (row tile, column tile)
    e = _leaky_relu(f1_ref[...] + f2t_ref[...], alpha)               # (TM, TN)
    e = jnp.where(adj_ref[...] > 0, e, jnp.float32(NEG_BIG)) + colmask

    # online softmax: never materializes the full NxN attention matrix
    m_prev = m_ref[...]
    m_new = jnp.maximum(m_prev, e.max(axis=-1, keepdims=True))
    corr = jnp.exp(m_prev - m_new)
    p = jnp.exp(e - m_new)
    l_ref[...] = corr * l_ref[...] + p.sum(axis=-1, keepdims=True)

    # Wh is pinned whole in VMEM; slice this column tile in place (no re-DMA per row tile)
    row0 = pl.multiple_of(j * tn, tn)
    wh_tile = wh_ref[pl.ds(row0, tn), :]
    acc_ref[...] = corr * acc_ref[...] + jnp.dot(
        p, wh_tile, preferred_element_type=jnp.float32)
    m_ref[...] = m_new

    @pl.when(j == pl.num_programs(1) - 1)
    def _():
        h_prime = acc_ref[...] * pl.reciprocal(l_ref[...], approx=False)
        if concat:
            h_prime = _leaky_relu(h_prime, alpha)
        out_ref[...] = h_prime.astype(out_ref.dtype)


def _attention(n_arr, f1, f2t, adj_pad, wh, *, alpha, concat, tm, tn):
    n_pad = adj_pad.shape[0]
    cout_pad = wh.shape[1]
    grid = (n_pad // tm, n_pad // tn)

    # VMEM budget: pinned Wh (worst-case x2 buffers) + streamed tiles + scratch.
    vmem_need = (2 * n_pad * cout_pad * 4        # pinned Wh
                 + 2 * tm * tn                   # adj int8 tiles
                 + 2 * (tm + tn) * 4             # f1 / f2^T tiles
                 + 2 * tm * cout_pad * 4         # output tiles
                 + tm * cout_pad * 4 + 2 * tm * 4)  # acc + m + l scratch
    vmem_limit = int(min(max(2 * vmem_need, 32 << 20), 64 << 20))  # v7x-safe cap

    cost = pl.CostEstimate(
        flops=2 * n_pad * n_pad * cout_pad + 12 * n_pad * n_pad,
        transcendentals=n_pad * n_pad + 2 * n_pad * grid[1],
        bytes_accessed=(adj_pad.size                                  # int8 adjacency
                        + 4 * (wh.size + f1.size + f2t.size
                               + n_pad * cout_pad)),
    )
    kernel = functools.partial(_attention_kernel, alpha=alpha, concat=concat, tn=tn)
    return pl.pallas_call(
        kernel,
        out_shape=jax.ShapeDtypeStruct((n_pad, cout_pad), jnp.float32),
        grid_spec=pltpu.PrefetchScalarGridSpec(
            num_scalar_prefetch=1,                      # true node count n -> SMEM
            grid=grid,
            in_specs=[
                pl.BlockSpec((tm, 1), lambda i, j, n_s: (i, 0)),       # f1
                pl.BlockSpec((1, tn), lambda i, j, n_s: (0, j)),       # f2^T
                pl.BlockSpec((tm, tn), lambda i, j, n_s: (i, j)),      # adj int8 tile
                pl.BlockSpec((n_pad, cout_pad), lambda i, j, n_s: (0, 0)),  # pinned Wh
            ],
            out_specs=pl.BlockSpec((tm, cout_pad), lambda i, j, n_s: (i, 0)),
            scratch_shapes=[
                pltpu.VMEM((tm, 1), jnp.float32),          # running max
                pltpu.VMEM((tm, 1), jnp.float32),          # running denom
                pltpu.VMEM((tm, cout_pad), jnp.float32),   # att @ Wh accumulator
            ],
        ),
        compiler_params=pltpu.CompilerParams(
            dimension_semantics=("parallel", "arbitrary"),
            vmem_limit_bytes=vmem_limit),
        cost_estimate=cost,
    )(n_arr, f1, f2t, adj_pad, wh)


# --------------------------------- module wrapper ---------------------------------- #
class GraphAttentionLayerP1Pallas:
    """JAX/Pallas port of ptens GraphAttentionLayer_P1 (inference path)."""

    def __init__(self, in_channels, out_channels, d_prob=0.5, alpha=0.5,
                 cat=True, key=None):
        self.in_channels = in_channels
        self.out_channels = out_channels
        self.alpha = float(alpha)
        self.concat = bool(cat)
        self.d_prob = d_prob  # dropout is identity at inference
        if key is None:
            key = jax.random.PRNGKey(0)
        k_w, k_a = jax.random.split(key)
        gain = 1.414
        # xavier_uniform_(gain): U(-b, b), b = gain * sqrt(6 / (fan_in + fan_out))
        bw = gain * float(np.sqrt(6.0 / (in_channels + out_channels)))
        self.W = jax.random.uniform(k_w, (in_channels, out_channels),
                                    jnp.float32, minval=-bw, maxval=bw)
        ba = gain * float(np.sqrt(6.0 / (2 * out_channels + 1)))
        self.a = jax.random.uniform(k_a, (2 * out_channels, 1),
                                    jnp.float32, minval=-ba, maxval=ba)

    @staticmethod
    def _tiles(n):
        tn = TN if _round_up(n, LANE) >= TN else LANE
        tm = min(TM, tn)               # keep >=2 row tiles when possible (megacore)
        n_pad = _round_up(n, max(tm, tn))
        return tm, tn, n_pad

    def prepare_adjacency(self, adj):
        """Pad + cast adjacency to int8 once; reuse across calls for a static graph."""
        n = adj.shape[0]
        _, _, n_pad = self._tiles(n)
        return (jnp.zeros((n_pad, n_pad), jnp.int8)
                .at[:n, :n].set((adj > 0).astype(jnp.int8)))

    def __call__(self, h, adj=None, adj_padded=None):
        n, cin = h.shape
        cout = self.out_channels
        tm, tn, n_pad = self._tiles(n)
        tk = min(TK, _round_up(cin, LANE))
        cin_pad = _round_up(cin, tk)
        cout_pad = _round_up(max(cout, 1), LANE)

        # lane-dense, tile-aligned zero padding (exact: padded W/a columns are 0,
        # padded adj columns are removed from the softmax by the in-kernel col mask)
        h_pad = jnp.zeros((n_pad, cin_pad), jnp.float32).at[:n, :cin].set(h)
        w_pad = jnp.zeros((cin_pad, cout_pad), jnp.float32).at[:cin, :cout].set(self.W)
        # packed attention projections: column 0 = a1, column 1 = a2, rest 0
        a_pack = (jnp.zeros((cout_pad, LANE), jnp.float32)
                  .at[:cout, 0].set(self.a[:cout, 0])
                  .at[:cout, 1].set(self.a[cout:, 0]))
        if adj_padded is None:
            if adj is None:
                raise ValueError("either adj or adj_padded must be provided")
            adj_padded = self.prepare_adjacency(adj)

        wh, f_pack = _wh_projection(h_pad, w_pad, a_pack, tm=tm, tk=tk)
        f1 = f_pack[:, 0:1]                     # (n_pad, 1)
        f2t = f_pack[:, 1].reshape(1, n_pad)    # (1, n_pad)
        n_arr = jnp.array([n], jnp.int32)
        out_pad = _attention(n_arr, f1, f2t, adj_padded, wh,
                             alpha=self.alpha, concat=self.concat, tm=tm, tn=tn)
        return out_pad[:n, :cout]


# --------------------------------------- main --------------------------------------- #
if __name__ == "__main__":
    key = jax.random.PRNGKey(0)
    k_h, k_adj, k_params = jax.random.split(key, 3)

    num_nodes = 200          # pads to 256 -> exercises 2 row tiles + column padding
    in_channels = 8
    out_channels = 32

    h = jax.random.normal(k_h, (num_nodes, in_channels), jnp.float32)
    adj = (jax.random.uniform(k_adj, (num_nodes, num_nodes)) < 0.05
           ).astype(jnp.float32)
    adj = jnp.maximum(adj, jnp.eye(num_nodes, dtype=jnp.float32))  # self-loops

    layer = GraphAttentionLayerP1Pallas(in_channels, out_channels,
                                        d_prob=0.5, alpha=0.5, cat=True,
                                        key=k_params)
    # pad/cast the (static) adjacency once, outside the hot path
    adj_i8 = jax.block_until_ready(layer.prepare_adjacency(adj))
    out = jax.block_until_ready(layer(h, adj_padded=adj_i8))

    # ------------------- pure-JAX reference (same math, no Pallas) -------------------
    Wh = h @ layer.W
    f1 = Wh @ layer.a[:out_channels]
    f2 = Wh @ layer.a[out_channels:]
    e = _leaky_relu(f1 + f2.T, layer.alpha)
    masked = jnp.where(adj > 0, e, NEG_BIG)
    att = jax.nn.softmax(masked, axis=1)
    ref = att @ Wh
    if layer.concat:
        ref = _leaky_relu(ref, layer.alpha)

    np.testing.assert_allclose(np.asarray(out), np.asarray(ref),
                               rtol=1e-4, atol=1e-4)
    print("KERNEL_OK")
</pallas_src>

<mosaic_0001>
module attributes {stable_mosaic.version = 11 : i64} {
  func.func @_wh_kernel_single(%arg0: i32, %arg1: memref<128x128xf32, #tpu.memory_space<vmem>>, %arg2: memref<128x128xf32, #tpu.memory_space<vmem>>, %arg3: memref<128x128xf32, #tpu.memory_space<vmem>>, %arg4: memref<128x128xf32, #tpu.memory_space<vmem>>, %arg5: memref<128x128xf32, #tpu.memory_space<vmem>>) attributes {dimension_semantics = [#tpu.dimension_semantics<parallel>], iteration_bounds = array<i64: 2>, scalar_prefetch = 0 : i64, scratch_operands = 0 : i64, tpu.core_type = #tpu.core_type<tc>, window_params = [{transform_indices = @transform_0, window_bounds = array<i64: 128, 128>}, {pipeline_mode = #tpu.pipeline_mode<synchronous>, transform_indices = @transform_1, window_bounds = array<i64: 128, 128>}, {pipeline_mode = #tpu.pipeline_mode<synchronous>, transform_indices = @transform_2, window_bounds = array<i64: 128, 128>}, {transform_indices = @transform_3, window_bounds = array<i64: 128, 128>}, {transform_indices = @transform_4, window_bounds = array<i64: 128, 128>}]} {
    %c0 = arith.constant 0 : index
    %c0_0 = arith.constant 0 : index
    %0 = vector.load %arg1[%c0, %c0_0] : memref<128x128xf32, #tpu.memory_space<vmem>>, vector<128x128xf32>
    %c0_1 = arith.constant 0 : index
    %c0_2 = arith.constant 0 : index
    %1 = vector.load %arg2[%c0_1, %c0_2] : memref<128x128xf32, #tpu.memory_space<vmem>>, vector<128x128xf32>
    %cst = arith.constant dense<0.000000e+00> : vector<128x128xf32>
    %2 = tpu.matmul %0, %1, %cst {dimension_numbers = #tpu.dot_dimension_numbers<[1], [0], [0], [1], [0, 0, 1, 1], [], []>} : vector<128x128xf32>, vector<128x128xf32>, vector<128x128xf32> -> vector<128x128xf32>
    %c0_3 = arith.constant 0 : index
    %c0_4 = arith.constant 0 : index
    %3 = vector.load %arg4[%c0_3, %c0_4] : memref<128x128xf32, #tpu.memory_space<vmem>>, vector<128x128xf32>
    tpu.vector_store %arg4[%c0_3, %c0_4], %2 {strides = array<i32>} : memref<128x128xf32, #tpu.memory_space<vmem>>, vector<128x128xf32>,
    %c0_5 = arith.constant 0 : index
    %c0_6 = arith.constant 0 : index
    %4 = vector.load %arg3[%c0_5, %c0_6] : memref<128x128xf32, #tpu.memory_space<vmem>>, vector<128x128xf32>
    %cst_7 = arith.constant dense<0.000000e+00> : vector<128x128xf32>
    %5 = tpu.matmul %2, %4, %cst_7 {dimension_numbers = #tpu.dot_dimension_numbers<[1], [0], [0], [1], [0, 0, 1, 1], [], []>} : vector<128x128xf32>, vector<128x128xf32>, vector<128x128xf32> -> vector<128x128xf32>
    %c0_8 = arith.constant 0 : index
    %c0_9 = arith.constant 0 : index
    %6 = vector.load %arg5[%c0_8, %c0_9] : memref<128x128xf32, #tpu.memory_space<vmem>>, vector<128x128xf32>
    tpu.vector_store %arg5[%c0_8, %c0_9], %5 {strides = array<i32>} : memref<128x128xf32, #tpu.memory_space<vmem>>, vector<128x128xf32>,
    return
  }
  func.func @transform_0(%arg0: i32) -> (i32, i32) {
    %c0_i32 = arith.constant 0 : i32
    %c0_i32_0 = arith.constant 0 : i32
    return %arg0, %c0_i32 : i32, i32
  }
  func.func @transform_1(%arg0: i32) -> (i32, i32) {
    %c0_i32 = arith.constant 0 : i32
    %c0_i32_0 = arith.constant 0 : i32
    %c0_i32_1 = arith.constant 0 : i32
    return %c0_i32, %c0_i32_0 : i32, i32
  }
  func.func @transform_2(%arg0: i32) -> (i32, i32) {
    %c0_i32 = arith.constant 0 : i32
    %c0_i32_0 = arith.constant 0 : i32
    %c0_i32_1 = arith.constant 0 : i32
    return %c0_i32, %c0_i32_0 : i32, i32
  }
  func.func @transform_3(%arg0: i32) -> (i32, i32) {
    %c0_i32 = arith.constant 0 : i32
    %c0_i32_0 = arith.constant 0 : i32
    return %arg0, %c0_i32 : i32, i32
  }
  func.func @transform_4(%arg0: i32) -> (i32, i32) {
    %c0_i32 = arith.constant 0 : i32
    %c0_i32_0 = arith.constant 0 : i32
    return %arg0, %c0_i32 : i32, i32
  }
}

</mosaic_0001>

<bundles_post_ra>
// kernel: tpu_custom_call.1
= control target key start
LH: loop header
LB: loop body
LE: loop exit
PB: predicated region body
PF: predicated region fallthrough
CT: control target
= control target key end

     0   :  { %10 = vsyncpa [#allocation3], 0  ;;  %s1231_s0 = inlined_call_operand.hbm [shape: f32[256,128], index: 0, kind: input, shape index: {}]   ;;  %s1232_s1 = inlined_call_operand.hbm [shape: f32[128,128], index: 1, kind: input, shape index: {}]   ;;  %s1233_s2 = inlined_call_operand.hbm [shape: f32[128,128], index: 2, kind: input, shape index: {}]   ;;  %s1234_s3 = inlined_call_operand.hbm [shape: f32[256,128], index: 3, kind: output, shape index: {0}]   ;;  %s1235_s4 = inlined_call_operand.hbm [shape: f32[256,128], index: 4, kind: output, shape index: {1}]  }
   0x1   :  { %12 = vsyncpa [#allocation3 + $0x1], 0 }
   0x2   :  { %13 = vsyncpa [#allocation6], 0 }
   0x3   :  { %14 = vsyncpa [#allocation4], 0 }
   0x4   :  { %16 = vsyncpa [#allocation4 + $0x1], 0 }
   0x5   :  { %17 = vsyncpa [#allocation10], 0 }
   0x6   :  { %19 = vsyncpa [#allocation10 + $0x1], 0  ;;  %s996_s15 = smov 0   ;;  %s998_s16 = smov 0  }
   0x7   :  { %s1000_s17 = smov 0   ;;  %s1002_s18 = smov 0  }
   0x8 LB: > { %s1017_s19 = sadd.s32 4294967295, %s963_s18   ;;  %s638_s20 = sadd.s32 4294967294, %s963_s18   ;;  %s963_s18 = sphi %s1002_s18, %s1245_s18   ;;  %s959_s17 = sphi %s1000_s17, %s1244_s17   ;;  %s955_s16 = sphi %s998_s16, %s1243_s16   ;;  %s951_s15 = sphi %s996_s15, %s1242_s15  }
   0x9   : > { %p45_p0 = scmp.ne.s32.totalorder %s955_s16, %s951_s15  ;;  %p46_p1 = scmp.eq.s32.totalorder %s1017_s19, 0 }
   0xa   : > { %p111_p2 = scmp.eq.s32.totalorder %s1017_s19, 1  ;;  %p117_p3 = scmp.eq.s32.totalorder %s638_s20, 1 }
   0xb   : > { %p1026_p4 = por %p46_p1, %p45_p0  ;;  %p639_p5 = scmp.ge.s32.totalorder %s963_s18, 1 }
   0xc   : > { %p1031_p6 = por %p117_p3, %p45_p0  ;;  %p150_p7 = scmp.lt.s32.totalorder %s963_s18, 3 }
   0xd   : > { %s161_s25 = sshll.u32 %s1232_s1, 4  ;;  %s965_s27 = smov [#allocation5]   ;;  %s162_s25 = int_to_ptr.hbm [resolvable:$true] %s161_s25 }
   0xe   : > { %p1039_p8 = pnand %p639_p5, %p150_p7  ;;  %s163_s28 = sshll.u32 %s965_s27, 4  ;;  %s164_s28 = int_to_ptr.vmem [resolvable:$true] %s163_s28 }
   0xf   : > { %s175_s5 = sshll.u32 %s1233_s2, 4  ;;  %s966_s6 = smov 128   ;;  %s176_s5 = int_to_ptr.hbm [resolvable:$true] %s175_s5 }
  0x10   : > { %p709_p9 = pneg %p1039_p8  ;;  %s967_s7 = smov 8  }
  0x11   : > { %s968_s8 = smov [#allocation7]   ;;  %s1058_s10 = sadd.s32 1, %s963_s18  }
  0x12   : > { %p710_p10 = pnand %p709_p9, %p46_p1  ;;  %s177_s9 = sshll.u32 %s968_s8, 4  ;;  %s178_s9 = int_to_ptr.vmem [resolvable:$true] %s177_s9 }
  0x13   : > { %s32_s11 = sadd.s32 1, %s959_s17  ;;  %s29_s12 = ssub.s32 %s963_s18, %s1058_s10 }
  0x14   : > { %712 = dma.hbm_to_vmem [thread:$0]  (!%p710_p10), %s162_s25, 2048, %s164_s28, [#allocation6], %s966_s6, %s966_s6, %s967_s7  }
  0x15   : > { %715 = dma.hbm_to_vmem [thread:$0]  (!%p710_p10), %s176_s5, 2048, %s178_s9, [#allocation6], %s966_s6, %s966_s6, %s967_s7  }
  0x16   : > { %p39_p12 = scmp.ne.s32.totalorder %s959_s17, %s955_s16  ;;  %p30_p13 = scmp.eq.s32.totalorder %s29_s12, 0 }
  0x17   : > { %p40_p0 = scmp.eq.s32.totalorder %s963_s18, 0  ;;  %p729_p5 = scmp.lt.s32.totalorder %s963_s18, 2 }
  0x18   : > { %p1068_p3 = por %p111_p2, %p39_p12  ;;  %s191_s20 = sand.u32 1, %s959_s17  }
  0x19   : > { %s1074_s14 = scalar_select %p30_p13, %s959_s17, %s32_s11  }
  0x1a   : > { %p41_p7 = por %p40_p0, %p39_p12  ;;  %s643_s23 = sshll.u32 %s191_s20, 7 }
  0x1b   : > { %s660_s24 = sshll.u32 %s963_s18, 7  ;;  %s195_s29 = scalar_lea.vmem [#allocation2], %s643_s23 }
  0x1c   : > { %s200_s28 = scalar_lea.hbm %s1231_s0, %s660_s24  ;;  %s203_s30 = sshll.u32 %s195_s29, 4  ;;  %s204_s30 = int_to_ptr.vmem [resolvable:$true] %s203_s30 }
  0x1d   : > { %s201_s5 = sshll.u32 %s200_s28, 4  ;;  %p1081_p2 = pnand %p729_p5, %p41_p7  ;;  %s202_s5 = int_to_ptr.hbm [resolvable:$true] %s201_s5 }
  0x1e   : > { %s192_s9 = scalar_lea.sflag [#allocation3], %s191_s20  ;;  %s831_s11 = sshra.s32 %s202_s5, 4  ;;  %s832_s11 = int_to_ptr.hbm [resolvable:$true] %s831_s11 }
  0x1f   : > { %s833_s12 = scalar_lea.hbm %s832_s11, 128  ;;  %p835_p10 = pneg %p1081_p2 }
  0x20   : > { %p834_p9 = scmp.ne.s32.totalorder %s832_s11, %s833_s12  ;;  %s838_s25 = scalar_lea.hbm %s1231_s0, 256 }
  0x21   : > { %p839_p0 = scmp.lt.s32.totalorder %s832_s11, %s1231_s0  ;;  %p840_p5 = scmp.lt.s32.totalorder %s838_s25, %s833_s12 }
  0x22   : > { %p836_p12 = pnand %p835_p10, %p834_p9 }
  0x23   : > { %p841_p7 = por %p840_p5, %p839_p0 }
  0x24   : > { %p837_p13 = pneg %p836_p12 }
  0x26   : > { %p842_p11 = pnand %p841_p7, %p837_p13 }
  0x28   : > { %845 = shalt.err (!%p842_p11)
}
  0x29   : > { %719 = dma.hbm_to_vmem [thread:$0]  (!%p1081_p2), %s202_s5, 2048, %s204_s30, %s192_s9, %s966_s6, %s966_s6, %s967_s7  }
  0x2a   : > { %215 = sbr.rel (%p1039_p8) target bundleno = 405 (0x195), region = 32  ;;  %s1101_s20 = sand.u32 (!%p1039_p8), 1, %s955_s16  }
  0x2b   : > { %s1104_s29 = sshll.u32 (!%p1039_p8), %s1101_s20, 7  ;;  %s218_s11 = scalar_lea.sflag (!%p1039_p8), [#allocation3], %s1101_s20 }
  0x2c   : > { %s1108_s12 = scalar_lea.vmem (!%p1039_p8), [#allocation2], %s1104_s29 }
  0x2f   : > { %934 = dma.done.wait (%p1026_p4), %s218_s11, 2048  }
  0x30   : > { %936 = vsyncadd (%p1026_p4), %s218_s11, 4294965248 }
  0x31   : > { %938 = dma.done.wait (%p46_p1), [#allocation6], 4096  }
  0x32   : > { %940 = vsyncadd (%p46_p1), [#allocation6], 4294963200  ;;  %v296_v0 = vld [vmem:[#allocation5 + $0x78] sm:$0xff]  ;;  %v295_v1 = vld [vmem:[#allocation5 + $0x70] sm:$0xff]  ;;  %s1135_s21 = scalar_lea.vmem [#allocation8], %s1104_s29  ;;  %s661_s26 = sshll.u32 %s1017_s19, 7 }
  0x33   : > { %663 = vmatpush.msra.mxu2 %v296_v0  ;;  %297 = vmatpush.msra.mxu0 %v296_v0  ;;  %v294_v2 = vld [vmem:[#allocation5 + $0x68] sm:$0xff]  ;;  %v293_v3 = vld [vmem:[#allocation5 + $0x60] sm:$0xff]  ;;  %v292_v4 = vld [vmem:[#allocation5 + $0x58] sm:$0xff]  ;;  %s492_s30 = scalar_lea.hbm %s1234_s3, %s661_s26  ;;  %s493_s5 = sshll.u32 %s1135_s21, 4  ;;  %s494_s5 = int_to_ptr.vmem [resolvable:$true] %s493_s5 }
  0x34   : > { %v291_v5 = vld [vmem:[#allocation5 + $0x50] sm:$0xff]  ;;  %v290_v6 = vld [vmem:[#allocation5 + $0x48] sm:$0xff]  ;;  %v289_v7 = vld [vmem:[#allocation5 + $0x40] sm:$0xff]  ;;  %s495_s8 = sshll.u32 %s492_s30, 4  ;;  %s476_s9 = scalar_lea.sflag [#allocation4], %s1101_s20  ;;  %s496_s8 = int_to_ptr.hbm [resolvable:$true] %s495_s8 }
  0x35   : > { %664 = vmatpush.msra.mxu2 %v295_v1  ;;  %298 = vmatpush.msra.mxu0 %v295_v1  ;;  %v288_v8 = vld [vmem:[#allocation5 + $0x38] sm:$0xff]  ;;  %v287_v9 = vld [vmem:[#allocation5 + $0x30] sm:$0xff]  ;;  %v286_v10 = vld [vmem:[#allocation5 + $0x28] sm:$0xff]  ;;  %s875_s24 = sshra.s32 %s496_s8, 4  ;;  %s881_s28 = scalar_lea.hbm %s1234_s3, 256  ;;  %s876_s24 = int_to_ptr.hbm [resolvable:$true] %s875_s24 }
  0x36   : > { %v285_v11 = vld [vmem:[#allocation5 + $0x20] sm:$0xff]  ;;  %v284_v12 = vld [vmem:[#allocation5 + $0x18] sm:$0xff]  ;;  %v283_v13 = vld [vmem:[#allocation5 + $0x10] sm:$0xff]  ;;  %s877_s23 = scalar_lea.hbm %s876_s24, 128  ;;  %p882_p11 = scmp.lt.s32.totalorder %s876_s24, %s1234_s3 }
  0x37   : > { %665 = vmatpush.msra.mxu2 %v294_v2  ;;  %299 = vmatpush.msra.mxu0 %v294_v2  ;;  %v282_v14 = vld [vmem:[#allocation5 + $0x8] sm:$0xff]  ;;  %v281_v15 = vld [vmem:[#allocation5] sm:$0xff]  ;;  %v275_v20 = vld [vmem:[%s1108_s12 + $0x50] sm:$0xff]  ;;  %p878_p1 = scmp.ne.s32.totalorder %s876_s24, %s877_s23  ;;  %p883_p2 = scmp.lt.s32.totalorder %s881_s28, %s877_s23 }
  0x38   : > { %v273_v16 = vld [vmem:[%s1108_s12 + $0x40] sm:$0xff]  ;;  %v274_v18 = vld [vmem:[%s1108_s12 + $0x48] sm:$0xff]  ;;  %v267_v21 = vld [vmem:[%s1108_s12 + $0x10] sm:$0xff] }
  0x39   : > { %666 = vmatpush.msra.mxu2 %v293_v3  ;;  %300 = vmatpush.msra.mxu0 %v293_v3  ;;  %v265_v17 = vld [vmem:[%s1108_s12] sm:$0xff]  ;;  %v266_v19 = vld [vmem:[%s1108_s12 + $0x8] sm:$0xff]  ;;  %v276_v22 = vld [vmem:[%s1108_s12 + $0x58] sm:$0xff]  ;;  %p879_p4 = pnand %p878_p1, %p1068_p3  ;;  %p884_p9 = por %p883_p2, %p882_p11 }
  0x3a   : > { %v268_v23 = vld [vmem:[%s1108_s12 + $0x18] sm:$0xff]  ;;  %v392_v25 = vld [vmem:[#allocation7 + $0x70] sm:$0xff]  ;;  %v391_v26 = vld [vmem:[#allocation7 + $0x68] sm:$0xff] }
  0x3b   : > { %667 = vmatpush.msra.mxu2 %v292_v4  ;;  %301 = vmatpush.msra.mxu0 %v292_v4  ;;  %v393_v24 = vld [vmem:[#allocation7 + $0x78] sm:$0xff]  ;;  %v390_v27 = vld [vmem:[#allocation7 + $0x60] sm:$0xff]  ;;  %v388_v31 = vld [vmem:[#allocation7 + $0x50] sm:$0xff]  ;;  %p880_p8 = pneg %p879_p4 }
  0x3c   : > { %679 = vmatpush.msra.mxu3 %v393_v24  ;;  %394 = vmatpush.msra.mxu1 %v393_v24  ;;  %v277_v28 = vld [vmem:[%s1108_s12 + $0x60] sm:$0xff]  ;;  %v389_v30 = vld [vmem:[#allocation7 + $0x58] sm:$0xff]  ;;  %v387_v32 = vld [vmem:[#allocation7 + $0x48] sm:$0xff] }
  0x3d   : > { %668 = vmatpush.msra.mxu2 %v291_v5  ;;  %302 = vmatpush.msra.mxu0 %v291_v5  ;;  %v269_v29 = vld [vmem:[%s1108_s12 + $0x20] sm:$0xff]  ;;  %v278_v34 = vld [vmem:[%s1108_s12 + $0x68] sm:$0xff]  ;;  %v385_v36 = vld [vmem:[#allocation7 + $0x38] sm:$0xff]  ;;  %p885_p10 = pnand %p884_p9, %p880_p8 }
  0x3e   : > { %680 = vmatpush.msra.mxu3 %v392_v25  ;;  %395 = vmatpush.msra.mxu1 %v392_v25  ;;  %v386_v33 = vld [vmem:[#allocation7 + $0x40] sm:$0xff]  ;;  %v270_v35 = vld [vmem:[%s1108_s12 + $0x28] sm:$0xff]  ;;  %v384_v37 = vld [vmem:[#allocation7 + $0x30] sm:$0xff] }
  0x3f   : > { %669 = vmatpush.msra.mxu2 %v290_v6  ;;  %303 = vmatpush.msra.mxu0 %v290_v6  ;;  %v383_v38 = vld [vmem:[#allocation7 + $0x28] sm:$0xff]  ;;  %v382_v39 = vld [vmem:[#allocation7 + $0x20] sm:$0xff]  ;;  %v279_v40 = vld [vmem:[%s1108_s12 + $0x70] sm:$0xff] }
  0x40   : > { %681 = vmatpush.msra.mxu3 %v391_v26  ;;  %396 = vmatpush.msra.mxu1 %v391_v26  ;;  %v271_v41 = vld [vmem:[%s1108_s12 + $0x30] sm:$0xff]  ;;  %v381_v42 = vld [vmem:[#allocation7 + $0x18] sm:$0xff]  ;;  %v379_v44 = vld [vmem:[#allocation7 + $0x8] sm:$0xff] }
  0x41   : > { %670 = vmatpush.msra.mxu2 %v289_v7  ;;  %304 = vmatpush.msra.mxu0 %v289_v7  ;;  %v380_v43 = vld [vmem:[#allocation7 + $0x10] sm:$0xff]  ;;  %v280_v45 = vld [vmem:[%s1108_s12 + $0x78] sm:$0xff]  ;;  %v378_v47 = vld [vmem:[#allocation7] sm:$0xff] }
  0x42   : > { %682 = vmatpush.msra.mxu3 %v390_v27  ;;  %397 = vmatpush.msra.mxu1 %v390_v27  ;;  %v272_v46 = vld [vmem:[%s1108_s12 + $0x38] sm:$0xff] }
  0x43   : > { %671 = vmatpush.msra.mxu2 %v288_v8  ;;  %305 = vmatpush.msra.mxu0 %v288_v8 }
  0x44   : > { %683 = vmatpush.msra.mxu3 %v389_v30  ;;  %398 = vmatpush.msra.mxu1 %v389_v30 }
  0x45   : > { %672 = vmatpush.msra.mxu2 %v287_v9  ;;  %306 = vmatpush.msra.mxu0 %v287_v9 }
  0x46   : > { %684 = vmatpush.msra.mxu3 %v388_v31  ;;  %399 = vmatpush.msra.mxu1 %v388_v31 }
  0x47   : > { %673 = vmatpush.msra.mxu2 %v286_v10  ;;  %307 = vmatpush.msra.mxu0 %v286_v10 }
  0x48   : > { %685 = vmatpush.msra.mxu3 %v387_v32  ;;  %400 = vmatpush.msra.mxu1 %v387_v32 }
  0x49   : > { %674 = vmatpush.msra.mxu2 %v285_v11  ;;  %308 = vmatpush.msra.mxu0 %v285_v11 }
  0x4a   : > { %686 = vmatpush.msra.mxu3 %v386_v33  ;;  %401 = vmatpush.msra.mxu1 %v386_v33 }
  0x4b   : > { %675 = vmatpush.msra.mxu2 %v284_v12  ;;  %309 = vmatpush.msra.mxu0 %v284_v12 }
  0x4c   : > { %687 = vmatpush.msra.mxu3 %v385_v36  ;;  %402 = vmatpush.msra.mxu1 %v385_v36 }
  0x4d   : > { %676 = vmatpush.msra.mxu2 %v283_v13  ;;  %310 = vmatpush.msra.mxu0 %v283_v13 }
  0x4e   : > { %688 = vmatpush.msra.mxu3 %v384_v37  ;;  %403 = vmatpush.msra.mxu1 %v384_v37 }
  0x4f   : > { %677 = vmatpush.msra.mxu2 %v282_v14  ;;  %311 = vmatpush.msra.mxu0 %v282_v14 }
  0x50   : > { %689 = vmatpush.msra.mxu3 %v383_v38  ;;  %404 = vmatpush.msra.mxu1 %v383_v38 }
  0x51   : > { %678 = vmatpush.msra.mxu2 %v281_v15  ;;  %312 = vmatpush.msra.mxu0 %v281_v15 }
  0x52   : > { %337 = vmatmul.f32.vlgmr.msra.gmra.mxu2 %v273_v16  ;;  %313 = vmatmul.f32.vlgmr.msra.gmra.mxu0 %v265_v17 }
  0x53   : > { %690 = vmatpush.msra.mxu3 %v382_v39  ;;  %405 = vmatpush.msra.mxu1 %v382_v39 }
  0x55   : > { %691 = vmatpush.msra.mxu3 %v381_v42  ;;  %406 = vmatpush.msra.mxu1 %v381_v42 }
  0x57   : > { %692 = vmatpush.msra.mxu3 %v380_v43  ;;  %407 = vmatpush.msra.mxu1 %v380_v43 }
  0x59   : > { %693 = vmatpush.msra.mxu3 %v379_v44  ;;  %408 = vmatpush.msra.mxu1 %v379_v44 }
  0x5a   : > { %340 = vmatmul.f32.gmra.mxu2 %v274_v18  ;;  %316 = vmatmul.f32.gmra.mxu0 %v266_v19 }
  0x5b   : > { %694 = vmatpush.msra.mxu3 %v378_v47  ;;  %409 = vmatpush.msra.mxu1 %v378_v47 }
  0x62   : > { %343 = vmatmul.f32.gmra.mxu2 %v275_v20  ;;  %319 = vmatmul.f32.gmra.mxu0 %v267_v21 }
  0x6a   : > { %346 = vmatmul.f32.gmra.mxu2 %v276_v22  ;;  %322 = vmatmul.f32.gmra.mxu0 %v268_v23 }
  0x72   : > { %349 = vmatmul.f32.gmra.mxu2 %v277_v28  ;;  %325 = vmatmul.f32.gmra.mxu0 %v269_v29 }
  0x7a   : > { %352 = vmatmul.f32.gmra.mxu2 %v278_v34  ;;  %328 = vmatmul.f32.gmra.mxu0 %v270_v35 }
  0x82   : > { %355 = vmatmul.f32.gmra.mxu2 %v279_v40  ;;  %331 = vmatmul.f32.gmra.mxu0 %v271_v41 }
  0x8a   : > { %358 = vmatmul.f32.gmra.mxu2 %v280_v45  ;;  %334 = vmatmul.f32.gmra.mxu0 %v272_v46 }
  0xcf   : > { %v314_v48 = vpop.f32.mrf.mxu0 }
  0xd0   : > { %362 = vst [vmem:[%s1135_s21] sm:$0xff] %v314_v48  ;;  %410 = vmatmul.f32.vlgmr.msra.gmra.mxu1 %v314_v48 }
  0xd5   : > { %v338_v49 = vpop.f32.mrf.mxu2 }
  0xd6   : > { %370 = vst [vmem:[%s1135_s21 + $0x40] sm:$0xff] %v338_v49  ;;  %434 = vmatmul.f32.vlgmr.msra.gmra.mxu3 %v338_v49 }
  0xd7   : > { %v317_v50 = vpop.f32.mrf.mxu0 }
  0xd8   : > { %363 = vst [vmem:[%s1135_s21 + $0x8] sm:$0xff] %v317_v50  ;;  %413 = vmatmul.f32.gmra.mxu1 %v317_v50 }
  0xdd   : > { %v341_v51 = vpop.f32.mrf.mxu2 }
  0xde   : > { %371 = vst [vmem:[%s1135_s21 + $0x48] sm:$0xff] %v341_v51  ;;  %437 = vmatmul.f32.gmra.mxu3 %v341_v51 }
  0xdf   : > { %v320_v52 = vpop.f32.mrf.mxu0 }
  0xe0   : > { %364 = vst [vmem:[%s1135_s21 + $0x10] sm:$0xff] %v320_v52  ;;  %416 = vmatmul.f32.gmra.mxu1 %v320_v52 }
  0xe5   : > { %v344_v53 = vpop.f32.mrf.mxu2 }
  0xe6   : > { %372 = vst [vmem:[%s1135_s21 + $0x50] sm:$0xff] %v344_v53  ;;  %440 = vmatmul.f32.gmra.mxu3 %v344_v53 }
  0xe7   : > { %v323_v54 = vpop.f32.mrf.mxu0 }
  0xe8   : > { %365 = vst [vmem:[%s1135_s21 + $0x18] sm:$0xff] %v323_v54  ;;  %419 = vmatmul.f32.gmra.mxu1 %v323_v54 }
  0xed   : > { %v347_v55 = vpop.f32.mrf.mxu2 }
  0xee   : > { %373 = vst [vmem:[%s1135_s21 + $0x58] sm:$0xff] %v347_v55  ;;  %443 = vmatmul.f32.gmra.mxu3 %v347_v55 }
  0xef   : > { %v326_v56 = vpop.f32.mrf.mxu0 }
  0xf0   : > { %366 = vst [vmem:[%s1135_s21 + $0x20] sm:$0xff] %v326_v56  ;;  %422 = vmatmul.f32.gmra.mxu1 %v326_v56 }
  0xf5   : > { %v350_v57 = vpop.f32.mrf.mxu2 }
  0xf6   : > { %374 = vst [vmem:[%s1135_s21 + $0x60] sm:$0xff] %v350_v57  ;;  %446 = vmatmul.f32.gmra.mxu3 %v350_v57 }
  0xf7   : > { %v329_v58 = vpop.f32.mrf.mxu0 }
  0xf8   : > { %367 = vst [vmem:[%s1135_s21 + $0x28] sm:$0xff] %v329_v58  ;;  %425 = vmatmul.f32.gmra.mxu1 %v329_v58 }
  0xfd   : > { %v353_v59 = vpop.f32.mrf.mxu2 }
  0xfe   : > { %375 = vst [vmem:[%s1135_s21 + $0x68] sm:$0xff] %v353_v59  ;;  %449 = vmatmul.f32.gmra.mxu3 %v353_v59 }
  0xff   : > { %v332_v60 = vpop.f32.mrf.mxu0 }
 0x100   : > { %368 = vst [vmem:[%s1135_s21 + $0x30] sm:$0xff] %v332_v60  ;;  %428 = vmatmul.f32.gmra.mxu1 %v332_v60 }
 0x105   : > { %v356_v61 = vpop.f32.mrf.mxu2 }
 0x106   : > { %376 = vst [vmem:[%s1135_s21 + $0x70] sm:$0xff] %v356_v61  ;;  %452 = vmatmul.f32.gmra.mxu3 %v356_v61 }
 0x107   : > { %v335_v62 = vpop.f32.mrf.mxu0 }
 0x108   : > { %369 = vst [vmem:[%s1135_s21 + $0x38] sm:$0xff] %v335_v62  ;;  %431 = vmatmul.f32.gmra.mxu1 %v335_v62 }
 0x10d   : > { %v359_v63 = vpop.f32.mrf.mxu2 }
 0x10e   : > { %377 = vst [vmem:[%s1135_s21 + $0x78] sm:$0xff] %v359_v63  ;;  %455 = vmatmul.f32.gmra.mxu3 %v359_v63 }
 0x10f   : > { %888 = shalt.err (!%p885_p10)
}
 0x110   : > { %s969_s21 = smov 128   ;;  %s970_s6 = smov 8  }
 0x111   : > { %705 = dma.vmem_to_hbm [thread:$0]  (%p1068_p3), %s494_s5, 2048, %s496_s8, %s476_s9, %s969_s21, %s969_s21, %s970_s6  }
 0x112   : > { %s1175_s7 = scalar_lea.vmem [#allocation9], %s1104_s29  ;;  %s509_s5 = scalar_lea.hbm %s1235_s4, %s661_s26 }
 0x113   : > { %s510_s8 = sshll.u32 %s1175_s7, 4  ;;  %s512_s9 = sshll.u32 %s509_s5, 4  ;;  %s511_s8 = int_to_ptr.vmem [resolvable:$true] %s510_s8  ;;  %s513_s9 = int_to_ptr.hbm [resolvable:$true] %s512_s9 }
 0x114   : > { %s481_s24 = scalar_lea.sflag [#allocation10], %s1101_s20  ;;  %s903_s23 = sshra.s32 %s513_s9, 4  ;;  %s904_s23 = int_to_ptr.hbm [resolvable:$true] %s903_s23 }
 0x115   : > { %s905_s25 = scalar_lea.hbm %s904_s23, 128  ;;  %s909_s28 = scalar_lea.hbm %s1235_s4, 256 }
 0x116   : > { %p906_p12 = scmp.ne.s32.totalorder %s904_s23, %s905_s25  ;;  %p910_p5 = scmp.lt.s32.totalorder %s904_s23, %s1235_s4 }
 0x117   : > { %p911_p7 = scmp.lt.s32.totalorder %s909_s28, %s905_s25 }
 0x118   : > { %p907_p13 = pnand %p906_p12, %p1068_p3 }
 0x119   : > { %p912_p1 = por %p911_p7, %p910_p5 }
 0x11a   : > { %p908_p0 = pneg %p907_p13 }
 0x11c   : > { %p913_p4 = pnand %p912_p1, %p908_p0 }
 0x14d   : > { %v411_v0 = vpop.f32.mrf.mxu1 }
 0x14e   : > { %459 = vst [vmem:[%s1175_s7] sm:$0xff] %v411_v0 }
 0x155   : > { %v414_v1 = vpop.f32.mrf.mxu1 }
 0x156   : > { %460 = vst [vmem:[%s1175_s7 + $0x8] sm:$0xff] %v414_v1 }
 0x159   : > { %v435_v2 = vpop.f32.mrf.mxu3 }
 0x15a   : > { %467 = vst [vmem:[%s1175_s7 + $0x40] sm:$0xff] %v435_v2 }
 0x15d   : > { %v417_v3 = vpop.f32.mrf.mxu1 }
 0x15e   : > { %461 = vst [vmem:[%s1175_s7 + $0x10] sm:$0xff] %v417_v3 }
 0x161   : > { %v438_v4 = vpop.f32.mrf.mxu3 }
 0x162   : > { %468 = vst [vmem:[%s1175_s7 + $0x48] sm:$0xff] %v438_v4 }
 0x165   : > { %v420_v5 = vpop.f32.mrf.mxu1 }
 0x166   : > { %462 = vst [vmem:[%s1175_s7 + $0x18] sm:$0xff] %v420_v5 }
 0x169   : > { %v441_v6 = vpop.f32.mrf.mxu3 }
 0x16a   : > { %469 = vst [vmem:[%s1175_s7 + $0x50] sm:$0xff] %v441_v6 }
 0x16d   : > { %v423_v7 = vpop.f32.mrf.mxu1 }
 0x16e   : > { %463 = vst [vmem:[%s1175_s7 + $0x20] sm:$0xff] %v423_v7 }
 0x171   : > { %v444_v8 = vpop.f32.mrf.mxu3 }
 0x172   : > { %470 = vst [vmem:[%s1175_s7 + $0x58] sm:$0xff] %v444_v8 }
 0x175   : > { %v426_v9 = vpop.f32.mrf.mxu1 }
 0x176   : > { %464 = vst [vmem:[%s1175_s7 + $0x28] sm:$0xff] %v426_v9 }
 0x179   : > { %v447_v10 = vpop.f32.mrf.mxu3 }
 0x17a   : > { %471 = vst [vmem:[%s1175_s7 + $0x60] sm:$0xff] %v447_v10 }
 0x17d   : > { %v429_v11 = vpop.f32.mrf.mxu1 }
 0x17e   : > { %465 = vst [vmem:[%s1175_s7 + $0x30] sm:$0xff] %v429_v11 }
 0x181   : > { %v450_v12 = vpop.f32.mrf.mxu3 }
 0x182   : > { %472 = vst [vmem:[%s1175_s7 + $0x68] sm:$0xff] %v450_v12 }
 0x185   : > { %v432_v13 = vpop.f32.mrf.mxu1 }
 0x186   : > { %466 = vst [vmem:[%s1175_s7 + $0x38] sm:$0xff] %v432_v13 }
 0x189   : > { %v453_v14 = vpop.f32.mrf.mxu3 }
 0x18a   : > { %473 = vst [vmem:[%s1175_s7 + $0x70] sm:$0xff] %v453_v14 }
 0x191   : > { %v456_v15 = vpop.f32.mrf.mxu3 }
 0x192   : > { %474 = vst [vmem:[%s1175_s7 + $0x78] sm:$0xff] %v456_v15 }
 0x193   : > { %916 = shalt.err (!%p913_p4)
}
 0x194   : > { %706 = dma.vmem_to_hbm [thread:$0]  (%p1068_p3), %s511_s8, 2048, %s513_s9, %s481_s24, %s969_s21, %s969_s21, %s970_s6  }
 0x195 PF: > { %s527_s20 = sand.u32 1, %s951_s15   ;;  %p1241_p8 = scmp.ge.s32.totalorder %s963_s18, 2 }
 0x196   : > { %s528_s12 = scalar_lea.sflag [#allocation4], %s527_s20 }
 0x197   : > { %p721_p11 = pnand %p1241_p8, %p1031_p6 }
 0x199   : > { %p722_p2 = pneg %p721_p11 }
 0x19b   : > { %942 = dma.done.wait (%p722_p2), %s528_s12, 2048  }
 0x19c   : > { %944 = vsyncadd (%p722_p2), %s528_s12, 4294965248  ;;  %s538_s7 = scalar_lea.sflag [#allocation10], %s527_s20 }
 0x19d   : > { %946 = dma.done.wait (%p722_p2), %s538_s7, 2048  }
 0x19e   : > { %948 = vsyncadd (%p722_p2), %s538_s7, 4294965248  ;;  %p22_p3 = scmp.ge.s32.totalorder %s1058_s10, 4   ;;  %s1242_s15 = smov %s955_s16 }
 0x19f   : > { %s1243_s16 = smov %s959_s17  ;;  %s1244_s17 = smov %s1074_s14 }
 0x1a0   : > { %s1245_s18 = smov %s1058_s10  ;;  %24 = sbr.rel (!%p22_p3) target bundleno = 8 (0x8), region = 102 }
 0x1a5   :  { %544 = vsyncpa [#allocation3], 1 }
 0x1a6   :  { %546 = vsyncpa [#allocation3 + $0x1], 1 }
 0x1a7   :  { %547 = vsyncpa [#allocation6], 1 }
 0x1a8   :  { %548 = vsyncpa [#allocation4], 1 }
 0x1a9   :  { %550 = vsyncpa [#allocation4 + $0x1], 1 }
 0x1aa   :  { %551 = vsyncpa [#allocation10], 1 }
 0x1ab   :  { %553 = vsyncpa [#allocation10 + $0x1], 1 }

</bundles_post_ra>
